<compile_context>
chip_gen: v7x
topology: tpu7x:2x2x1
jax: 0.10.0
libtpu: 0.0.40
codegen_flags: <defaults>
</compile_context>

<pallas_src>
import jax
import jax.numpy as jnp
from jax.experimental import pallas as pl
from jax.experimental.pallas import tpu as pltpu


def mlp_kernel(xT_ref, w1_ref, b1_ref, w2_ref, b2_ref, w3_ref, b3_ref, oT_ref):
    # xT_ref: [num_inputs, TILE_B]   (batch on lanes -> lane-dense everywhere)
    # Layer 1: [30, ni] @ [ni, TILE_B] + [30, 1]  -> ReLU
    h1 = jnp.dot(w1_ref[...], xT_ref[...], preferred_element_type=jnp.float32)
    h1 = jnp.maximum(h1 + b1_ref[...], 0.0)
    # Layer 2: [20, 30] @ [30, TILE_B] + [20, 1]  -> ReLU
    h2 = jnp.dot(w2_ref[...], h1, preferred_element_type=jnp.float32)
    h2 = jnp.maximum(h2 + b2_ref[...], 0.0)
    # Layer 3: [no, 20] @ [20, TILE_B] + [no, 1]  (logits, no activation)
    out = jnp.dot(w3_ref[...], h2, preferred_element_type=jnp.float32)
    oT_ref[...] = (out + b3_ref[...]).astype(oT_ref.dtype)


def neural_network_forward(x, params, *, tile_b=16384):
    """Forward pass matching torch NeuralNetwork.

    x: [batch, num_inputs]; params = (w1, b1, w2, b2, w3, b3) with weights in
    PyTorch layout [out_features, in_features] and biases [out_features, 1].
    Returns logits [batch, num_outputs].

    The problem is computed transposed (batch on the lane axis); the wrapper
    transposes are pure layout plumbing.  A caller that keeps activations
    feature-major can skip them entirely.
    """
    w1, b1, w2, b2, w3, b3 = params
    batch, num_inputs = x.shape
    num_outputs = w3.shape[0]

    # Batch tile: it is the last dim of the pipelined blocks, so it must be a
    # multiple of 128 or cover the full batch extent.
    tb = min(tile_b, batch)
    if tb < batch:
        tb = max(128, (tb // 128) * 128)
    grid = (pl.cdiv(batch, tb),)

    x_t = x.T  # [num_inputs, batch]  (layout plumbing; batch lands on lanes)

    def resident(arr):
        # Whole array, same block index every grid step -> stays VMEM-resident.
        return pl.BlockSpec(arr.shape, lambda i: (0, 0))

    out_t = pl.pallas_call(
        mlp_kernel,
        out_shape=jax.ShapeDtypeStruct((num_outputs, batch), x.dtype),
        grid=grid,
        in_specs=[
            pl.BlockSpec((num_inputs, tb), lambda i: (0, i)),  # x^T tile
            resident(w1), resident(b1),
            resident(w2), resident(b2),
            resident(w3), resident(b3),
        ],
        out_specs=pl.BlockSpec((num_outputs, tb), lambda i: (0, i)),
        compiler_params=pltpu.CompilerParams(
            dimension_semantics=("parallel",),  # shard batch tiles over TCs
        ),
    )(x_t, w1, b1, w2, b2, w3, b3)

    return out_t.T  # [batch, num_outputs]


def init_params(key, num_inputs, num_outputs, dtype=jnp.float32):
    """PyTorch-style uniform(-1/sqrt(fan_in), 1/sqrt(fan_in)) init.

    Weights in [out_features, in_features] (PyTorch layout), biases [out, 1].
    """
    dims = [(num_inputs, 30), (30, 20), (20, num_outputs)]
    params = []
    for fan_in, fan_out in dims:
        key, kw, kb = jax.random.split(key, 3)
        bound = 1.0 / float(fan_in) ** 0.5
        w = jax.random.uniform(kw, (fan_out, fan_in), dtype, -bound, bound)
        b = jax.random.uniform(kb, (fan_out, 1), dtype, -bound, bound)
        params.extend([w, b])
    return tuple(params)


def reference_forward(x, params):
    w1, b1, w2, b2, w3, b3 = params
    h1 = jnp.maximum(x @ w1.T + b1.T, 0.0)
    h2 = jnp.maximum(h1 @ w2.T + b2.T, 0.0)
    return h2 @ w3.T + b3.T


if __name__ == "__main__":
    key = jax.random.PRNGKey(0)
    key, kx = jax.random.split(key)

    # Small deterministic example; tile_b=128 exercises a 2-step pipelined grid.
    batch, num_inputs, num_outputs = 256, 4, 3
    x = jax.random.normal(kx, (batch, num_inputs), jnp.float32)
    params = init_params(key, num_inputs, num_outputs)

    out = neural_network_forward(x, params, tile_b=128)
    out = jax.block_until_ready(out)

    ref = reference_forward(x, params)
    assert out.shape == (batch, num_outputs)
    max_err = float(jnp.max(jnp.abs(out - ref)))
    assert jnp.allclose(out, ref, atol=1e-4, rtol=1e-4), max_err

    print("KERNEL_OK")
</pallas_src>

<mosaic_0001>
module attributes {stable_mosaic.version = 11 : i64} {
  func.func @mlp_kernel(%arg0: i32, %arg1: memref<4x128xf32, #tpu.memory_space<vmem>>, %arg2: memref<30x4xf32, #tpu.memory_space<vmem>>, %arg3: memref<30x1xf32, #tpu.memory_space<vmem>>, %arg4: memref<20x30xf32, #tpu.memory_space<vmem>>, %arg5: memref<20x1xf32, #tpu.memory_space<vmem>>, %arg6: memref<3x20xf32, #tpu.memory_space<vmem>>, %arg7: memref<3x1xf32, #tpu.memory_space<vmem>>, %arg8: memref<3x128xf32, #tpu.memory_space<vmem>>) attributes {dimension_semantics = [#tpu.dimension_semantics<parallel>], iteration_bounds = array<i64: 2>, scalar_prefetch = 0 : i64, scratch_operands = 0 : i64, tpu.core_type = #tpu.core_type<tc>, window_params = [{transform_indices = @transform_0, window_bounds = array<i64: 4, 128>}, {pipeline_mode = #tpu.pipeline_mode<synchronous>, transform_indices = @transform_1, window_bounds = array<i64: 30, 4>}, {pipeline_mode = #tpu.pipeline_mode<synchronous>, transform_indices = @transform_2, window_bounds = array<i64: 30, 1>}, {pipeline_mode = #tpu.pipeline_mode<synchronous>, transform_indices = @transform_3, window_bounds = array<i64: 20, 30>}, {pipeline_mode = #tpu.pipeline_mode<synchronous>, transform_indices = @transform_4, window_bounds = array<i64: 20, 1>}, {pipeline_mode = #tpu.pipeline_mode<synchronous>, transform_indices = @transform_5, window_bounds = array<i64: 3, 20>}, {pipeline_mode = #tpu.pipeline_mode<synchronous>, transform_indices = @transform_6, window_bounds = array<i64: 3, 1>}, {transform_indices = @transform_7, window_bounds = array<i64: 3, 128>}]} {
    %c0 = arith.constant 0 : index
    %c0_0 = arith.constant 0 : index
    %0 = vector.load %arg2[%c0, %c0_0] : memref<30x4xf32, #tpu.memory_space<vmem>>, vector<30x4xf32>
    %c0_1 = arith.constant 0 : index
    %c0_2 = arith.constant 0 : index
    %1 = vector.load %arg1[%c0_1, %c0_2] : memref<4x128xf32, #tpu.memory_space<vmem>>, vector<4x128xf32>
    %cst = arith.constant dense<0.000000e+00> : vector<30x128xf32>
    %2 = tpu.matmul %0, %1, %cst {dimension_numbers = #tpu.dot_dimension_numbers<[1], [0], [0], [1], [0, 0, 1, 1], [], []>} : vector<30x4xf32>, vector<4x128xf32>, vector<30x128xf32> -> vector<30x128xf32>
    %c0_3 = arith.constant 0 : index
    %c0_4 = arith.constant 0 : index
    %3 = vector.load %arg3[%c0_3, %c0_4] : memref<30x1xf32, #tpu.memory_space<vmem>>, vector<30x1xf32>
    %4 = vector.broadcast %3 : vector<30x1xf32> to vector<30x128xf32>
    %5 = arith.addf %2, %4 : vector<30x128xf32>
    %cst_5 = arith.constant 0.000000e+00 : f32
    %6 = vector.broadcast %cst_5 : f32 to vector<30x128xf32>
    %7 = arith.maximumf %5, %6 : vector<30x128xf32>
    %c0_6 = arith.constant 0 : index
    %c0_7 = arith.constant 0 : index
    %8 = vector.load %arg4[%c0_6, %c0_7] : memref<20x30xf32, #tpu.memory_space<vmem>>, vector<20x30xf32>
    %cst_8 = arith.constant dense<0.000000e+00> : vector<20x128xf32>
    %9 = tpu.matmul %8, %7, %cst_8 {dimension_numbers = #tpu.dot_dimension_numbers<[1], [0], [0], [1], [0, 0, 1, 1], [], []>} : vector<20x30xf32>, vector<30x128xf32>, vector<20x128xf32> -> vector<20x128xf32>
    %c0_9 = arith.constant 0 : index
    %c0_10 = arith.constant 0 : index
    %10 = vector.load %arg5[%c0_9, %c0_10] : memref<20x1xf32, #tpu.memory_space<vmem>>, vector<20x1xf32>
    %11 = vector.broadcast %10 : vector<20x1xf32> to vector<20x128xf32>
    %12 = arith.addf %9, %11 : vector<20x128xf32>
    %cst_11 = arith.constant 0.000000e+00 : f32
    %13 = vector.broadcast %cst_11 : f32 to vector<20x128xf32>
    %14 = arith.maximumf %12, %13 : vector<20x128xf32>
    %c0_12 = arith.constant 0 : index
    %c0_13 = arith.constant 0 : index
    %15 = vector.load %arg6[%c0_12, %c0_13] : memref<3x20xf32, #tpu.memory_space<vmem>>, vector<3x20xf32>
    %cst_14 = arith.constant dense<0.000000e+00> : vector<3x128xf32>
    %16 = tpu.matmul %15, %14, %cst_14 {dimension_numbers = #tpu.dot_dimension_numbers<[1], [0], [0], [1], [0, 0, 1, 1], [], []>} : vector<3x20xf32>, vector<20x128xf32>, vector<3x128xf32> -> vector<3x128xf32>
    %c0_15 = arith.constant 0 : index
    %c0_16 = arith.constant 0 : index
    %17 = vector.load %arg7[%c0_15, %c0_16] : memref<3x1xf32, #tpu.memory_space<vmem>>, vector<3x1xf32>
    %18 = vector.broadcast %17 : vector<3x1xf32> to vector<3x128xf32>
    %19 = arith.addf %16, %18 : vector<3x128xf32>
    %c0_17 = arith.constant 0 : index
    %c0_18 = arith.constant 0 : index
    %20 = vector.load %arg8[%c0_17, %c0_18] : memref<3x128xf32, #tpu.memory_space<vmem>>, vector<3x128xf32>
    tpu.vector_store %arg8[%c0_17, %c0_18], %19 {strides = array<i32>} : memref<3x128xf32, #tpu.memory_space<vmem>>, vector<3x128xf32>,
    return
  }
  func.func @transform_0(%arg0: i32) -> (i32, i32) {
    %c0_i32 = arith.constant 0 : i32
    %c0_i32_0 = arith.constant 0 : i32
    return %c0_i32, %arg0 : i32, i32
  }
  func.func @transform_1(%arg0: i32) -> (i32, i32) {
    %c0_i32 = arith.constant 0 : i32
    %c0_i32_0 = arith.constant 0 : i32
    %c0_i32_1 = arith.constant 0 : i32
    return %c0_i32, %c0_i32_0 : i32, i32
  }
  func.func @transform_2(%arg0: i32) -> (i32, i32) {
    %c0_i32 = arith.constant 0 : i32
    %c0_i32_0 = arith.constant 0 : i32
    %c0_i32_1 = arith.constant 0 : i32
    return %c0_i32, %c0_i32_0 : i32, i32
  }
  func.func @transform_3(%arg0: i32) -> (i32, i32) {
    %c0_i32 = arith.constant 0 : i32
    %c0_i32_0 = arith.constant 0 : i32
    %c0_i32_1 = arith.constant 0 : i32
    return %c0_i32, %c0_i32_0 : i32, i32
  }
  func.func @transform_4(%arg0: i32) -> (i32, i32) {
    %c0_i32 = arith.constant 0 : i32
    %c0_i32_0 = arith.constant 0 : i32
    %c0_i32_1 = arith.constant 0 : i32
    return %c0_i32, %c0_i32_0 : i32, i32
  }
  func.func @transform_5(%arg0: i32) -> (i32, i32) {
    %c0_i32 = arith.constant 0 : i32
    %c0_i32_0 = arith.constant 0 : i32
    %c0_i32_1 = arith.constant 0 : i32
    return %c0_i32, %c0_i32_0 : i32, i32
  }
  func.func @transform_6(%arg0: i32) -> (i32, i32) {
    %c0_i32 = arith.constant 0 : i32
    %c0_i32_0 = arith.constant 0 : i32
    %c0_i32_1 = arith.constant 0 : i32
    return %c0_i32, %c0_i32_0 : i32, i32
  }
  func.func @transform_7(%arg0: i32) -> (i32, i32) {
    %c0_i32 = arith.constant 0 : i32
    %c0_i32_0 = arith.constant 0 : i32
    return %c0_i32, %arg0 : i32, i32
  }
}

</mosaic_0001>

<bundles_post_ra>
// kernel: tpu_custom_call.1
= control target key start
LH: loop header
LB: loop body
LE: loop exit
PB: predicated region body
PF: predicated region fallthrough
CT: control target
= control target key end

     0   :  { %12 = vsyncpa [#allocation3], 0  ;;  %s1081_s0 = inlined_call_operand.vmem [shape: f32[4,256], index: 0, kind: input, shape index: {}]   ;;  %s1082_s1 = inlined_call_operand.vmem [shape: f32[30,4], index: 1, kind: input, shape index: {}]   ;;  %s1083_s2 = inlined_call_operand.vmem [shape: f32[30,1], index: 2, kind: input, shape index: {}]   ;;  %s1084_s3 = inlined_call_operand.vmem [shape: f32[20,30], index: 3, kind: input, shape index: {}]   ;;  %s1085_s4 = inlined_call_operand.vmem [shape: f32[20,1], index: 4, kind: input, shape index: {}]   ;;  %s1086_s5 = inlined_call_operand.vmem [shape: f32[3,20], index: 5, kind: input, shape index: {}]   ;;  %s1087_s6 = inlined_call_operand.vmem [shape: f32[3,1], index: 6, kind: input, shape index: {}]   ;;  %s1088_s7 = inlined_call_operand.hbm [shape: f32[3,256], index: 7, kind: output, shape index: {}]  }
   0x1   :  { %14 = vsyncpa [#allocation3 + $0x1], 0  ;;  %s922_s24 = smov 0   ;;  %s924_s25 = smov 0  }
   0x2   :  { %s926_s26 = smov 0   ;;  %s928_s27 = smov 0  }
   0x3 LB: > { %s943_s28 = sadd.s32 4294967295, %s874_s27   ;;  %s685_s29 = sadd.s32 4294967294, %s874_s27   ;;  %s874_s27 = sphi %s928_s27, %s1094_s27   ;;  %s870_s26 = sphi %s926_s26, %s1093_s26   ;;  %s866_s25 = sphi %s924_s25, %s1092_s25   ;;  %s862_s24 = sphi %s922_s24, %s1091_s24  }
   0x4   : > { %s947_s30 = sadd.s32 1, %s874_s27   ;;  %s179_s8 = sadd.s32 1, %s870_s26 }
   0x5   : > { %s176_s9 = ssub.s32 %s874_s27, %s947_s30  ;;  %p189_p0 = scmp.ne.s32.totalorder %s870_s26, %s866_s25 }
   0x6   : > { %p177_p1 = scmp.eq.s32.totalorder %s176_s9, 0  ;;  %p190_p2 = scmp.eq.s32.totalorder %s943_s28, 1 }
   0x7   : > { %p195_p3 = scmp.ne.s32.totalorder %s866_s25, %s862_s24  ;;  %p196_p4 = scmp.eq.s32.totalorder %s685_s29, 1 }
   0x8   : > { %s958_s10 = scalar_select %p177_p1, %s870_s26, %s179_s8  }
   0x9   : > { %p960_p5 = por %p190_p2, %p189_p0  ;;  %p964_p6 = por %p196_p4, %p195_p3 }
   0xa   : > { %p688_p7 = scmp.ge.s32.totalorder %s874_s27, 1  ;;  %p239_p8 = scmp.lt.s32.totalorder %s874_s27, 3 }
   0xc   : > { %p240_p9 = pnand %p688_p7, %p239_p8 }
   0xd   : > { %p270_p10 = scmp.lt.s32.totalorder (!%p240_p9), %s943_s28, 1  ;;  %v274_v0 = vld [vmem:[%s1082_s1] sm:$0xff] (!%p240_p9)  ;;  %vm303_vm0 = vcmask (!%p240_p9), 31744   ;;  %v281_v2 = vld [vmem:[%s1083_s2 + $0x10] sm:$0xff] (!%p240_p9)  ;;  %v876_v3 = vmov (!%p240_p9), 0   ;;  %vm316_vm1 = vcmask (!%p240_p9), 1043456  }
   0xe   : > { %243 = sbr.rel (%p240_p9) target bundleno = 709 (0x2c5), region = 48  ;;  %724 = vmatprep.mubr.msk.f32.mxu0 (!%p240_p9), %vm303_vm0, %v274_v0  ;;  %v279_v1 = vld [vmem:[%s1083_s2] sm:$0xff] (!%p240_p9)  ;;  %810 = vset.pattern.permute.xlu0 (!%p240_p9), %v876_v3  ;;  %v280_v4 = vld [vmem:[%s1083_s2 + $0x8] sm:$0xff] (!%p240_p9)  ;;  %v282_v5 = vld [vmem:[%s1083_s2 + $0x18] sm:$0x3f] (!%p240_p9)  ;;  %v877_v14 = vmov (!%p240_p9), 0.0|0.0  }
   0xf   : > { %811 = vset.pattern.permute.xlu1 (!%p240_p9), %v876_v3  ;;  %285 = vperm.xlu0 (!%p240_p9), %810, %v279_v1   ;;  %v275_v7 = vld [vmem:[%s1082_s1 + $0x8] sm:$0xff] (!%p240_p9)  ;;  %v276_v8 = vld [vmem:[%s1082_s1 + $0x10] sm:$0xff] (!%p240_p9)  ;;  %v412_v9 = vld [vmem:[%s1085_s4] sm:$0xff] (!%p240_p9)  ;;  %vm878_vm2 = vmmov (!%p240_p9), 0   ;;  %v879_v15 = vmov (!%p240_p9), 0.0   ;;  %vm440_vm3 = vcmask (!%p240_p9), 1045504  }
  0x10   : > { %295 = vperm.xlu1 (!%p240_p9), %811, %v281_v2   ;;  %v413_v10 = vld [vmem:[%s1085_s4 + $0x8] sm:$0xff] (!%p240_p9)  ;;  %v277_v11 = vld [vmem:[%s1082_s1 + $0x18] sm:$0x3f] (!%p240_p9)  ;;  %v414_v12 = vld [vmem:[%s1085_s4 + $0x10] sm:$0xf] (!%p240_p9)  ;;  %756 = vmatprep.subr.bf16.mxu1 (!%p240_p9), %v877_v14  ;;  %vm880_vm4 = vmmov (!%p240_p9), 1  }
  0x11   : > { %v528_v13 = vld [vmem:[%s1087_s6] sm:$0x7] (!%p240_p9)  ;;  %738 = vmatprep.mubr.msk.f32.mxu1 (!%p240_p9), %vm878_vm2, %v879_v15  ;;  %vm761_vm5 = vmpackc.low (!%p240_p9), %vm440_vm3, %vm880_vm4  ;;  %vm430_vm6 = vcmask (!%p240_p9), 244736   ;;  %v410_v35 = vld [vmem:[%s1084_s3 + $0x8] sm:$0xff] (!%p240_p9)  ;;  %vm534_vm7 = vcmask (!%p240_p9), 162816   ;;  %s267_s22 = sand.u32 (!%p240_p9), 1, %s866_s25  }
  0x12   : > { %v409_v34 = vld [vmem:[%s1084_s3] sm:$0xff] (!%p240_p9)  ;;  %v411_v36 = vld [vmem:[%s1084_s3 + $0x10] sm:$0xf] (!%p240_p9)  ;;  %s689_s23 = sshll.u32 (!%p240_p9), %s267_s22, 2  ;;  %s703_s29 = sshll.u32 (!%p240_p9), %s943_s28, 6 }
  0x13   : > { %290 = vperm.xlu0 (!%p240_p9), %810, %v280_v4   ;;  %v527_v53 = vld [vmem:[%s1086_s5] sm:$0x7] (!%p240_p9)  ;;  %s1039_s15 = scalar_lea.hbm (!%p240_p9), %s1088_s7, %s703_s29  ;;  %s613_s16 = scalar_lea.sflag (!%p240_p9), [#allocation3], %s267_s22 }
  0x14   : > { %300 = vperm.xlu1 (!%p240_p9), %811, %v282_v5  }
  0x15   : > { %s271_s19 = scalar_select %p270_p10, %s943_s28, 1 }
  0x16   : > { %s881_s28 = smov [#allocation2]  }
  0x17   : > { %s690_s20 = sshll.u32 %s271_s19, 2  ;;  %417 = vperm.xlu0 %810, %v412_v9   ;;  %s816_s18 = sshll.u32 %s881_s28, 4  ;;  %s817_s18 = int_to_ptr.vmem [resolvable:$false] %s816_s18 }
  0x18   : > { %s273_s8 = scalar_lea.vmem %s1081_s0, %s690_s20  ;;  %422 = vperm.xlu1 %811, %v413_v10   ;;  %s818_s19 = scalar_lea.vmem %s817_s18, 128 }
  0x19   : > { %v278_v6 = vld [vmem:[%s273_s8] sm:$0xf]  ;;  %s269_s8 = scalar_lea.vmem [#allocation2], %s689_s23 }
  0x1a   : > { %722 = vmatprep.subr.msk.mxu0 %vm316_vm1, %v278_v6  ;;  %s626_s9 = sshll.u32 %s269_s8, 4  ;;  %s1041_s9 = int_to_ptr.vmem [resolvable:$true] %s626_s9 }
  0x1b   : > { %723 = vmatpush3.msk.msra.mxu0 %vm316_vm1, %v278_v6  ;;  %427 = vperm.xlu0 %810, %v414_v12   ;;  %s812_s17 = scalar_lea.vmem %s1041_s9, 64  ;;  %p819_p0 = scmp.lt.s32.totalorder %s1041_s9, %s817_s18 }
  0x1c   : > { %725 = vmatmul.mubr.msk.f32.vlgmr.msra.gmra.mrb[0].mxu0 %vm303_vm0, %v275_v7  ;;  %531 = vperm.xlu1 %811, %v528_v13   ;;  %p813_p11 = scmp.ne.s32.totalorder %s1041_s9, %s812_s17  ;;  %p820_p1 = scmp.lt.s32.totalorder %s818_s19, %s812_s17 }
  0x1d   : > { %727 = vmatprep.mubr.msk.f32.mxu0 %vm303_vm0, %v276_v8  ;;  %763 = vmatprep.subr.bf16.mxu0 %v877_v14 }
  0x1e   : > { %p814_p12 = pnand %p813_p11, %p960_p5  ;;  %p821_p2 = por %p820_p1, %p819_p0 }
  0x20   : > { %728 = vmatmul.mubr.msk.f32.gmra.mrb[2].mxu0 %vm303_vm0, %v277_v11  ;;  %p815_p13 = pneg %p814_p12 }
  0x21   : > { %753 = vmatprep.mubr.msk.f32.mxu0 %vm878_vm2, %v879_v15 }
  0x22   : > { %p822_p3 = pnand %p821_p2, %p815_p13 }
  0x8e   : > { %v286_v16 = vpop.permute.xlu0 %285 }
  0x8f   : > { %v296_v17 = vpop.permute.xlu1 %295 }
  0x92   : > { %v291_v18 = vpop.permute.xlu0 %290 }
  0x93   : > { %v301_v24 = vpop.permute.xlu1 %300 }
  0x96   : > { %v418_v39 = vpop.permute.xlu0 %417 }
  0x97   : > { %v423_v41 = vpop.permute.xlu1 %422 }
  0x9a   : > { %v428_v47 = vpop.permute.xlu0 %427 }
  0x9b   : > { %v532_v54 = vpop.permute.xlu1 %531 }
  0xef   : > { %v726_v19 = vpop.f32.mrb[0].mxu0 }
  0xf0   : > { %v392_v20 = vadd.f32 %v726_v19, %v291_v18  ;;  %v386_v21 = vpop.f32.mrb[1].mxu0 }
  0xf1   : > { %v387_v22 = vadd.f32 %v386_v21, %v286_v16 }
  0xf2   : > { %v406_v23 = vmax.f32 %v392_v20, 0.0 }
  0xf3   : > { %v405_v25 = vmax.f32 %v387_v22, 0.0  ;;  %v729_v26 = vpop.f32.mrb[2].mxu0 }
  0xf4   : > { %v402_v27 = vadd.f32 %v729_v26, %v301_v24  ;;  %v396_v28 = vpop.f32.mrb[3].mxu0 }
  0xf5   : > { %v397_v29 = vadd.f32 %v396_v28, %v296_v17  ;;  %v757_v30 = vpack.c.bf16 %v406_v23, %v405_v25 }
  0xf6   : > { %v408_v31 = vmax.f32 %v402_v27, 0.0 }
  0xf7   : > { %v407_v32 = vmax.f32 %v397_v29, 0.0  ;;  %758 = vmatpush3.bf16.msra.mxu1 %v757_v30 }
  0xf8   : > { %759 = vmatprep.subr.bf16.mxu1 %v877_v14 }
  0xf9   : > { %v760_v33 = vpack.c.bf16 %v408_v31, %v407_v32 }
  0xfb   : > { %762 = vmatpush3.bf16.msk.msra.mxu1 %vm761_vm5, %v760_v33 }
  0xfe   : > { %739 = vmatmul.mubr.msk.f32.vlgmr.msra.gmra.mrb[0].mxu1 %vm430_vm6, %v409_v34 }
  0xff   : > { %741 = vmatprep.mubr.msk.f32.mxu1 %vm878_vm2, %v879_v15 }
 0x102   : > { %742 = vmatmul.mubr.msk.f32.gmra.mrb[2].mxu1 %vm430_vm6, %v410_v35 }
 0x103   : > { %744 = vmatprep.mubr.msk.f32.mxu1 %vm878_vm2, %v879_v15 }
 0x106   : > { %745 = vmatmul.mubr.msk.f32.gmra.mrb[4].mxu1 %vm430_vm6, %v411_v36 }
 0x1d1   : > { %v510_v37 = vpop.f32.mrb[0].mxu1 }
 0x1d2   : > { %v740_v38 = vpop.f32.mrb[1].mxu1  ;;  %v511_v40 = vadd.f32 %v510_v37, %v418_v39 }
 0x1d4   : > { %v524_v45 = vmax.f32 %v511_v40, 0.0 }
 0x1d5   : > { %v515_v42 = vpop.f32.mrb[2].mxu1 }
 0x1d6   : > { %v516_v43 = vadd.f32 %v515_v42, %v423_v41  ;;  %v743_v44 = vpop.f32.mrb[3].mxu1 }
 0x1d8   : > { %v525_v46 = vmax.f32 %v516_v43, 0.0 }
 0x1d9   : > { %v520_v48 = vpop.f32.mrb[4].mxu1 }
 0x1da   : > { %v764_v49 = vpack.c.bf16 %v525_v46, %v524_v45  ;;  %v521_v50 = vadd.f32 %v520_v48, %v428_v47  ;;  %v746_v51 = vpop.f32.mrb[5].mxu1 }
 0x1dc   : > { %765 = vmatpush3.bf16.msra.mxu0 %v764_v49  ;;  %v526_v52 = vmax.f32 %v521_v50, 0.0 }
 0x1dd   : > { %751 = vmatprep.subr.mxu0 %v879_v15 }
 0x1e0   : > { %752 = vmatpush3.msk.msra.mxu0 %vm316_vm1, %v526_v52 }
 0x1e1   : > { %754 = vmatmul.mubr.msk.f32.vlgmr.msra.gmra.mrb[4].mxu0 %vm534_vm7, %v527_v53 }
 0x2b4   : > { %v607_v55 = vpop.f32.mrb[4].mxu0 }
 0x2b5   : > { %v608_v56 = vadd.f32 %v607_v55, %v532_v54  ;;  %v755_v57 = vpop.f32.mrb[5].mxu0 }
 0x2b7   : > { %611 = vst [vmem:[%s269_s8] sm:$0x7] %v608_v56 }
 0x2b8   : > { %825 = shalt.err (!%p822_p3)
}
 0x2b9   : > { %s826_s20 = scalar_lea.hbm %s1039_s15, 64  ;;  %s830_s23 = scalar_lea.hbm %s1088_s7, 128 }
 0x2ba   : > { %p827_p4 = scmp.ne.s32.totalorder %s1039_s15, %s826_s20  ;;  %p831_p9 = scmp.lt.u32.totalorder %s1039_s15, %s1088_s7 }
 0x2bb   : > { %p832_p10 = scmp.lt.u32.totalorder %s830_s23, %s826_s20  ;;  %p834_p12 = scmp.lt.u32.totalorder %s826_s20, %s1039_s15 }
 0x2bc   : > { %p828_p7 = pnand %p827_p4, %p960_p5 }
 0x2bd   : > { %p833_p11 = por %p832_p10, %p831_p9 }
 0x2be   : > { %p829_p8 = pneg %p828_p7 }
 0x2bf   : > { %p835_p13 = por %p834_p12, %p833_p11 }
 0x2c1   : > { %p836_p0 = pnand %p835_p13, %p829_p8 }
 0x2c3   : > { %839 = shalt.err (!%p836_p0)
}
 0x2c4   : > { %766 = dma.vmem_to_hbm [thread:$0]  (%p960_p5), %s1041_s9, 64, %s1039_s15, %s613_s16  }
 0x2c5 PF: > { %p772_p1 = scmp.ge.s32.totalorder %s874_s27, 2  ;;  %s638_s13 = sand.u32 1, %s862_s24  }
 0x2c6   : > { %s639_s14 = scalar_lea.sflag [#allocation3], %s638_s13 }
 0x2c7   : > { %p769_p2 = pnand %p772_p1, %p964_p6 }
 0x2c9   : > { %857 = dma.done.wait (!%p769_p2), %s639_s14, 64  }
 0x2ca   : > { %859 = vsyncadd (!%p769_p2), %s639_s14, 4294967232  ;;  %p17_p3 = scmp.ge.s32.totalorder %s947_s30, 4   ;;  %s1091_s24 = smov %s866_s25 }
 0x2cb   : > { %s1092_s25 = smov %s870_s26  ;;  %s1093_s26 = smov %s958_s10 }
 0x2cc   : > { %s1094_s27 = smov %s947_s30  ;;  %19 = sbr.rel (!%p17_p3) target bundleno = 3 (0x3), region = 83 }
 0x2d3   :  { %644 = vsyncpa [#allocation3], 1 }
 0x2d4   :  { %646 = vsyncpa [#allocation3 + $0x1], 1 }

</bundles_post_ra>
